<compile_context>
chip_gen: v5e
topology: v5e:2x2
jax: 0.10.0
libtpu: 0.0.40
codegen_flags: <defaults>
</compile_context>

<pallas_src>
import functools

import jax
import jax.numpy as jnp
from jax.experimental import pallas as pl
from jax.experimental.pallas import tpu as pltpu


def _focal_loss_kernel(logits_ref, labels_ref, sum_ref, cnt_ref, *,
                       gamma, ignore_lb, tile, n_inner, hw):
    s = pl.program_id(1)   # parallel pixel super-tile axis (v7x megacore)
    t = pl.program_id(2)   # "arbitrary" (reduction) pixel-tile axis

    # Per-(batch, super-tile) accumulator blocks are resident across t.
    @pl.when(t == 0)
    def _():
        sum_ref[...] = jnp.zeros_like(sum_ref)
        cnt_ref[...] = jnp.zeros_like(cnt_ref)

    x = logits_ref[...].astype(jnp.float32)        # (1, C, T) channels on sublanes
    labels = labels_ref[...].astype(jnp.int32)     # (1, 1, T) lane-dense

    # Numerically-stable softmax statistics over the channel (sublane) axis.
    m = jnp.max(x, axis=1, keepdims=True)          # (1, 1, T)
    z = x - m
    denom = jnp.sum(jnp.exp(z), axis=1, keepdims=True)   # (1, 1, T)

    # One-hot gather of the label channel (VPU compare + sublane-axis sum).
    ch = jax.lax.broadcasted_iota(jnp.int32, x.shape, dimension=1)   # (1, C, T)
    one_hot = ch == labels
    z_label = jnp.sum(jnp.where(one_hot, z, 0.0), axis=1, keepdims=True)

    # log_softmax / softmax evaluated ONLY at the label channel.
    log_sm_label = z_label - jnp.log(denom)        # (1, 1, T)
    sm_label = jnp.exp(log_sm_label)

    # Focal factor (1 - p)^gamma on the label column only.
    # NOTE: the max(.,0) clamp deviates from the reference only for
    # non-integer gamma when 1-p rounds slightly negative (reference NaNs).
    one_minus = jnp.maximum(1.0 - sm_label, 0.0)
    g = float(gamma)
    if g == 2.0:
        factor = one_minus * one_minus
    elif g == float(int(g)) and 0 <= int(g) <= 8:
        factor = one_minus if int(g) >= 1 else jnp.ones_like(one_minus)
        for _ in range(int(g) - 1):
            factor = factor * one_minus
    else:
        factor = jnp.power(one_minus, g)

    picked = factor * log_sm_label                 # factor * log_score at label

    # Valid = not ignore_lb AND inside the real pixel extent.  The pixel-extent
    # check kills both the ragged tail of the last tile (no host-side padding)
    # and any clamped overshoot tiles introduced by the super-tile split.
    gi = s * n_inner + t
    lane = jax.lax.broadcasted_iota(jnp.int32, labels.shape, dimension=2)
    in_range = (gi * tile + lane) < hw
    valid = jnp.logical_and(labels != ignore_lb, in_range)

    # Lane-dense elementwise accumulation; no per-step cross-lane reduce.
    sum_ref[...] += jnp.where(valid, -picked, 0.0)
    cnt_ref[...] += jnp.where(valid, 1.0, 0.0)


def _round_up(a: int, b: int) -> int:
    return ((a + b - 1) // b) * b


def _vmem_capacity_bytes() -> int:
    try:
        return int(pltpu.get_tpu_info().vmem_capacity_bytes)
    except Exception:
        return 64 * 1024 * 1024   # conservative fallback (v7x per-core VMEM)


def _pick_tile(n_ch, logit_itemsize, label_itemsize, hw, block_budget):
    """Pixels (lanes) per grid step: as large as the VMEM block budget allows."""
    per_pixel = (
        2 * n_ch * logit_itemsize   # double-buffered (1, C, T) logits blocks
        + 2 * label_itemsize        # double-buffered (1, 1, T) labels blocks
        + 4 * 4                     # sum/cnt f32 accumulator blocks
        + 3 * n_ch * 4              # headroom for compiler-materialized (C, T) f32 temps
    )
    tile = (block_budget // per_pixel // 128) * 128
    tile = max(128, tile)
    # Never tile past the lane-padded pixel extent.
    return min(tile, _round_up(hw, 128))


def softmax_focal_loss(logits, labels, gamma=2.0, ignore_lb=255, tile=None):
    """logits: (N, C, H, W) float (f32 or bf16); labels: (N, H, W) int.

    Returns the scalar mean focal loss over non-ignored pixels as float32.
    NOTE: if every pixel is ignore_lb the count is 0 and this yields NaN,
    matching PyTorch NLLLoss behavior.
    """
    N, C, H, W = logits.shape
    HW = H * W

    # No transpose, no host-side padding: channels on sublanes, pixels on lanes.
    x = logits.reshape(N, C, HW)
    label_dtype = jnp.int16 if max(C - 1, int(ignore_lb)) <= 32767 else jnp.int32
    y = labels.reshape(N, 1, HW).astype(label_dtype)

    # Per-generation VMEM budget (v7x: 64 MiB physical; v5e/v6e: 128 MiB),
    # consistent with the scoped limit handed to Mosaic below.
    vmem_cap = _vmem_capacity_bytes()
    vmem_limit = (vmem_cap * 3) // 4
    if tile is None:
        tile = _pick_tile(C, jnp.dtype(logits.dtype).itemsize,
                          jnp.dtype(label_dtype).itemsize, HW, vmem_limit // 2)
    if tile >= HW:
        tile = HW                              # whole pixel row in one block
    else:
        tile = max(128, (tile // 128) * 128)   # lane-aligned interior tiles

    n_tiles = pl.cdiv(HW, tile)                # ragged tail is masked in-kernel
    # v7x megacore: with a single batch item, split pixel tiles over a second
    # *parallel* axis so both TensorCores get work.
    n_super = 2 if (N == 1 and n_tiles >= 2) else 1
    n_inner = pl.cdiv(n_tiles, n_super)
    last_tile = n_tiles - 1

    def in_map(n, s, t):
        # Clamp overshoot tiles (s*n_inner + t >= n_tiles) to the last real
        # block; their contribution is zeroed by the in-kernel pixel mask.
        return (n, 0, jnp.minimum(s * n_inner + t, last_tile))

    def out_map(n, s, t):
        return (n * n_super + s, 0, 0)

    kernel = functools.partial(
        _focal_loss_kernel, gamma=float(gamma), ignore_lb=int(ignore_lb),
        tile=int(tile), n_inner=int(n_inner), hw=int(HW))

    sum_parts, cnt_parts = pl.pallas_call(
        kernel,
        out_shape=(
            jax.ShapeDtypeStruct((N * n_super, 1, tile), jnp.float32),
            jax.ShapeDtypeStruct((N * n_super, 1, tile), jnp.float32),
        ),
        grid_spec=pltpu.PrefetchScalarGridSpec(
            num_scalar_prefetch=0,
            grid=(N, n_super, n_inner),
            in_specs=[
                pl.BlockSpec((1, C, tile), in_map),
                pl.BlockSpec((1, 1, tile), in_map),
            ],
            out_specs=(
                pl.BlockSpec((1, 1, tile), out_map),
                pl.BlockSpec((1, 1, tile), out_map),
            ),
        ),
        compiler_params=pltpu.CompilerParams(
            dimension_semantics=("parallel", "parallel", "arbitrary"),
            vmem_limit_bytes=int(vmem_limit),
        ),
    )(x, y)

    # Single cross-lane reduction + mean over valid pixels (NLLLoss 'mean').
    total = jnp.sum(sum_parts)
    count = jnp.sum(cnt_parts)
    return (total / count).astype(jnp.float32)


def _reference_loss(logits, labels, gamma=2.0, ignore_lb=255):
    """Pure-JAX reference mirroring the PyTorch module."""
    scores = jax.nn.softmax(logits, axis=1)
    factor = jnp.power(1.0 - scores, gamma)
    log_score = factor * jax.nn.log_softmax(logits, axis=1)
    one_hot = jax.nn.one_hot(jnp.clip(labels, 0, logits.shape[1] - 1),
                             logits.shape[1], axis=1, dtype=log_score.dtype)
    picked = jnp.sum(log_score * one_hot, axis=1)        # (N, H, W)
    valid = labels != ignore_lb
    return jnp.sum(jnp.where(valid, -picked, 0.0)) / jnp.sum(valid)


if __name__ == "__main__":
    key = jax.random.PRNGKey(0)
    k1, k2, k3 = jax.random.split(key, 3)

    # --- Test 1: spec-sized shapes (N, C, H, W) = (2, 4, 16, 16), f32. ---
    N, C, H, W = 2, 4, 16, 16
    logits = jax.random.normal(k1, (N, C, H, W), dtype=jnp.float32)
    labels = jax.random.randint(k2, (N, H, W), 0, C, dtype=jnp.int32)
    ignore_mask = jax.random.uniform(k3, (N, H, W)) < 0.1
    labels = jnp.where(ignore_mask, 255, labels)

    loss = jax.block_until_ready(softmax_focal_loss(logits, labels))
    ref = jax.block_until_ready(_reference_loss(logits, labels))
    assert jnp.allclose(loss, ref, rtol=1e-5, atol=1e-6), ("f32", loss, ref)

    # --- Test 2: bf16 logits HBM stream (kernel upcasts per-tile to f32). ---
    logits_bf16 = logits.astype(jnp.bfloat16)
    loss_bf16 = jax.block_until_ready(softmax_focal_loss(logits_bf16, labels))
    ref_bf16 = jax.block_until_ready(
        _reference_loss(logits_bf16.astype(jnp.float32), labels))
    assert jnp.allclose(loss_bf16, ref_bf16, rtol=1e-4, atol=1e-4), \
        ("bf16", loss_bf16, ref_bf16)

    # --- Test 3: ragged HW (no-pad path), N==1 super-tile split, clamped
    #     overshoot tile: HW=300 with forced tile=128 -> n_tiles=3, n_super=2.
    kl, kk, km = jax.random.split(jax.random.PRNGKey(1), 3)
    N2, C2, H2, W2 = 1, 5, 15, 20
    logits2 = jax.random.normal(kl, (N2, C2, H2, W2), dtype=jnp.float32)
    labels2 = jax.random.randint(kk, (N2, H2, W2), 0, C2, dtype=jnp.int32)
    labels2 = jnp.where(jax.random.uniform(km, (N2, H2, W2)) < 0.1, 255, labels2)
    loss2 = jax.block_until_ready(softmax_focal_loss(logits2, labels2, tile=128))
    ref2 = jax.block_until_ready(_reference_loss(logits2, labels2))
    assert jnp.allclose(loss2, ref2, rtol=1e-5, atol=1e-6), ("ragged", loss2, ref2)

    print("KERNEL_OK")
</pallas_src>

<mosaic_0001>
module attributes {stable_mosaic.version = 11 : i64} {
  func.func @_focal_loss_kernel(%arg0: i32, %arg1: i32, %arg2: i32, %arg3: memref<1x4x256xf32, #tpu.memory_space<vmem>>, %arg4: memref<1x1x256xi16, #tpu.memory_space<vmem>>, %arg5: memref<1x1x256xf32, #tpu.memory_space<vmem>>, %arg6: memref<1x1x256xf32, #tpu.memory_space<vmem>>) attributes {dimension_semantics = [#tpu.dimension_semantics<parallel>, #tpu.dimension_semantics<parallel>, #tpu.dimension_semantics<arbitrary>], iteration_bounds = array<i64: 2, 1, 1>, scalar_prefetch = 0 : i64, scratch_operands = 0 : i64, tpu.core_type = #tpu.core_type<tc>, window_params = [{transform_indices = @transform_0, window_bounds = array<i64: 1, 4, 256>}, {transform_indices = @transform_1, window_bounds = array<i64: 1, 1, 256>}, {transform_indices = @transform_2, window_bounds = array<i64: 1, 1, 256>}, {transform_indices = @transform_3, window_bounds = array<i64: 1, 1, 256>}]} {
    %c0_i32 = arith.constant 0 : i32
    %0 = arith.cmpi eq, %arg2, %c0_i32 : i32
    %1 = arith.extui %0 : i1 to i32
    %c0_i32_0 = arith.constant 0 : i32
    %2 = arith.cmpi ne, %1, %c0_i32_0 : i32
    scf.if %2 {
      %cst_28 = arith.constant 0.000000e+00 : f32
      %53 = vector.broadcast %cst_28 : f32 to vector<1x1x256xf32>
      %c0_29 = arith.constant 0 : index
      %c0_30 = arith.constant 0 : index
      %c0_31 = arith.constant 0 : index
      %54 = vector.load %arg5[%c0_29, %c0_30, %c0_31] : memref<1x1x256xf32, #tpu.memory_space<vmem>>, vector<1x1x256xf32>
      tpu.vector_store %arg5[%c0_29, %c0_30, %c0_31], %53 {strides = array<i32>} : memref<1x1x256xf32, #tpu.memory_space<vmem>>, vector<1x1x256xf32>,
      %cst_32 = arith.constant 0.000000e+00 : f32
      %55 = vector.broadcast %cst_32 : f32 to vector<1x1x256xf32>
      %c0_33 = arith.constant 0 : index
      %c0_34 = arith.constant 0 : index
      %c0_35 = arith.constant 0 : index
      %56 = vector.load %arg6[%c0_33, %c0_34, %c0_35] : memref<1x1x256xf32, #tpu.memory_space<vmem>>, vector<1x1x256xf32>
      tpu.vector_store %arg6[%c0_33, %c0_34, %c0_35], %55 {strides = array<i32>} : memref<1x1x256xf32, #tpu.memory_space<vmem>>, vector<1x1x256xf32>,
    } else {
    }
    %c0 = arith.constant 0 : index
    %c0_1 = arith.constant 0 : index
    %c0_2 = arith.constant 0 : index
    %3 = vector.load %arg3[%c0, %c0_1, %c0_2] : memref<1x4x256xf32, #tpu.memory_space<vmem>>, vector<1x4x256xf32>
    %c0_3 = arith.constant 0 : index
    %c0_4 = arith.constant 0 : index
    %c0_5 = arith.constant 0 : index
    %4 = vector.load %arg4[%c0_3, %c0_4, %c0_5] : memref<1x1x256xi16, #tpu.memory_space<vmem>>, vector<1x1x256xi16>
    %5 = arith.extsi %4 : vector<1x1x256xi16> to vector<1x1x256xi32>
    %cst = arith.constant dense<0xFF800000> : vector<1x256xf32>
    %6 = vector.multi_reduction <maximumf>, %3, %cst [1] : vector<1x4x256xf32> to vector<1x256xf32>
    %7 = vector.shape_cast %6 : vector<1x256xf32> to vector<1x1x256xf32>
    %8 = vector.broadcast %7 : vector<1x1x256xf32> to vector<1x4x256xf32>
    %9 = arith.subf %3, %8 : vector<1x4x256xf32>
    %10 = math.exp %9 : vector<1x4x256xf32>
    %cst_6 = arith.constant dense<0.000000e+00> : vector<1x256xf32>
    %11 = vector.multi_reduction <add>, %10, %cst_6 [1] : vector<1x4x256xf32> to vector<1x256xf32>
    %12 = vector.shape_cast %11 : vector<1x256xf32> to vector<1x1x256xf32>
    %13 = tpu.iota {dimensions = array<i32: 1>} : vector<1x4x256xi32>
    %14 = vector.broadcast %5 : vector<1x1x256xi32> to vector<1x4x256xi32>
    %15 = arith.cmpi eq, %13, %14 : vector<1x4x256xi32>
    %cst_7 = arith.constant 0.000000e+00 : f32
    %16 = vector.broadcast %cst_7 : f32 to vector<1x4x256xf32>
    %17 = arith.select %15, %9, %16 : vector<1x4x256xi1>, vector<1x4x256xf32>
    %cst_8 = arith.constant dense<0.000000e+00> : vector<1x256xf32>
    %18 = vector.multi_reduction <add>, %17, %cst_8 [1] : vector<1x4x256xf32> to vector<1x256xf32>
    %19 = vector.shape_cast %18 : vector<1x256xf32> to vector<1x1x256xf32>
    %20 = math.log %12 : vector<1x1x256xf32>
    %21 = arith.subf %19, %20 : vector<1x1x256xf32>
    %22 = math.exp %21 : vector<1x1x256xf32>
    %cst_9 = arith.constant 1.000000e+00 : f32
    %23 = vector.broadcast %cst_9 : f32 to vector<1x1x256xf32>
    %24 = arith.subf %23, %22 : vector<1x1x256xf32>
    %cst_10 = arith.constant 0.000000e+00 : f32
    %25 = vector.broadcast %cst_10 : f32 to vector<1x1x256xf32>
    %26 = arith.maximumf %24, %25 : vector<1x1x256xf32>
    %27 = arith.mulf %26, %26 : vector<1x1x256xf32>
    %28 = arith.mulf %27, %21 : vector<1x1x256xf32>
    %c1_i32 = arith.constant 1 : i32
    %29 = arith.muli %arg1, %c1_i32 : i32
    %30 = arith.addi %29, %arg2 : i32
    %31 = tpu.iota {dimensions = array<i32: 2>} : vector<1x1x256xi32>
    %c256_i32 = arith.constant 256 : i32
    %32 = arith.muli %30, %c256_i32 : i32
    %33 = vector.broadcast %32 : i32 to vector<1x1x256xi32>
    %34 = arith.addi %33, %31 : vector<1x1x256xi32>
    %c256_i32_11 = arith.constant 256 : i32
    %35 = vector.broadcast %c256_i32_11 : i32 to vector<1x1x256xi32>
    %36 = arith.cmpi slt, %34, %35 : vector<1x1x256xi32>
    %c255_i32 = arith.constant 255 : i32
    %37 = vector.broadcast %c255_i32 : i32 to vector<1x1x256xi32>
    %38 = arith.cmpi ne, %5, %37 : vector<1x1x256xi32>
    %39 = arith.andi %38, %36 : vector<1x1x256xi1>
    %c0_12 = arith.constant 0 : index
    %c0_13 = arith.constant 0 : index
    %c0_14 = arith.constant 0 : index
    %40 = vector.load %arg5[%c0_12, %c0_13, %c0_14] : memref<1x1x256xf32, #tpu.memory_space<vmem>>, vector<1x1x256xf32>
    %cst_15 = arith.constant 0.000000e+00 : f32
    %41 = vector.broadcast %cst_15 : f32 to vector<1x1x256xf32>
    %42 = arith.subf %41, %28 : vector<1x1x256xf32>
    %cst_16 = arith.constant 0.000000e+00 : f32
    %43 = vector.broadcast %cst_16 : f32 to vector<1x1x256xf32>
    %44 = arith.select %39, %42, %43 : vector<1x1x256xi1>, vector<1x1x256xf32>
    %45 = arith.addf %40, %44 : vector<1x1x256xf32>
    %c0_17 = arith.constant 0 : index
    %c0_18 = arith.constant 0 : index
    %c0_19 = arith.constant 0 : index
    %46 = vector.load %arg5[%c0_17, %c0_18, %c0_19] : memref<1x1x256xf32, #tpu.memory_space<vmem>>, vector<1x1x256xf32>
    tpu.vector_store %arg5[%c0_17, %c0_18, %c0_19], %45 {strides = array<i32>} : memref<1x1x256xf32, #tpu.memory_space<vmem>>, vector<1x1x256xf32>,
    %c0_20 = arith.constant 0 : index
    %c0_21 = arith.constant 0 : index
    %c0_22 = arith.constant 0 : index
    %47 = vector.load %arg6[%c0_20, %c0_21, %c0_22] : memref<1x1x256xf32, #tpu.memory_space<vmem>>, vector<1x1x256xf32>
    %cst_23 = arith.constant 1.000000e+00 : f32
    %cst_24 = arith.constant 0.000000e+00 : f32
    %48 = vector.broadcast %cst_23 : f32 to vector<1x1x256xf32>
    %49 = vector.broadcast %cst_24 : f32 to vector<1x1x256xf32>
    %50 = arith.select %39, %48, %49 : vector<1x1x256xi1>, vector<1x1x256xf32>
    %51 = arith.addf %47, %50 : vector<1x1x256xf32>
    %c0_25 = arith.constant 0 : index
    %c0_26 = arith.constant 0 : index
    %c0_27 = arith.constant 0 : index
    %52 = vector.load %arg6[%c0_25, %c0_26, %c0_27] : memref<1x1x256xf32, #tpu.memory_space<vmem>>, vector<1x1x256xf32>
    tpu.vector_store %arg6[%c0_25, %c0_26, %c0_27], %51 {strides = array<i32>} : memref<1x1x256xf32, #tpu.memory_space<vmem>>, vector<1x1x256xf32>,
    return
  }
  func.func @transform_0(%arg0: i32, %arg1: i32, %arg2: i32) -> (i32, i32, i32) {
    %c1_i32 = arith.constant 1 : i32
    %0 = arith.muli %arg1, %c1_i32 : i32
    %1 = arith.addi %0, %arg2 : i32
    %c0_i32 = arith.constant 0 : i32
    %2 = arith.minsi %1, %c0_i32 : i32
    %c0_i32_0 = arith.constant 0 : i32
    %c0_i32_1 = arith.constant 0 : i32
    return %arg0, %c0_i32_0, %2 : i32, i32, i32
  }
  func.func @transform_1(%arg0: i32, %arg1: i32, %arg2: i32) -> (i32, i32, i32) {
    %c1_i32 = arith.constant 1 : i32
    %0 = arith.muli %arg1, %c1_i32 : i32
    %1 = arith.addi %0, %arg2 : i32
    %c0_i32 = arith.constant 0 : i32
    %2 = arith.minsi %1, %c0_i32 : i32
    %c0_i32_0 = arith.constant 0 : i32
    %c0_i32_1 = arith.constant 0 : i32
    return %arg0, %c0_i32_0, %2 : i32, i32, i32
  }
  func.func @transform_2(%arg0: i32, %arg1: i32, %arg2: i32) -> (i32, i32, i32) {
    %c1_i32 = arith.constant 1 : i32
    %0 = arith.muli %arg0, %c1_i32 : i32
    %1 = arith.addi %0, %arg1 : i32
    %c0_i32 = arith.constant 0 : i32
    %c0_i32_0 = arith.constant 0 : i32
    %c0_i32_1 = arith.constant 0 : i32
    return %1, %c0_i32, %c0_i32_0 : i32, i32, i32
  }
  func.func @transform_3(%arg0: i32, %arg1: i32, %arg2: i32) -> (i32, i32, i32) {
    %c1_i32 = arith.constant 1 : i32
    %0 = arith.muli %arg0, %c1_i32 : i32
    %1 = arith.addi %0, %arg1 : i32
    %c0_i32 = arith.constant 0 : i32
    %c0_i32_0 = arith.constant 0 : i32
    %c0_i32_1 = arith.constant 0 : i32
    return %1, %c0_i32, %c0_i32_0 : i32, i32, i32
  }
}

</mosaic_0001>

<bundles_post_ra>
// kernel: tpu_custom_call.1
= control target key start
LH: loop header
LB: loop body
LE: loop exit
PB: predicated region body
PF: predicated region fallthrough
CT: control target
= control target key end

     0   :  { %9 = vsyncpa [#allocation3], 0  ;;  %s1089_s0 = inlined_call_operand.hbm [shape: f32[2,4,256], index: 0, kind: input, shape index: {}]   ;;  %s1090_s1 = inlined_call_operand.vmem [shape: s16[2,1,256], index: 1, kind: input, shape index: {}]   ;;  %s1091_s2 = inlined_call_operand.hbm [shape: f32[2,1,256], index: 2, kind: output, shape index: {0}]   ;;  %s1092_s3 = inlined_call_operand.hbm [shape: f32[2,1,256], index: 3, kind: output, shape index: {1}]  }
   0x1   :  { %11 = vsyncpa [#allocation3 + $0x1], 0 }
   0x2   :  { %12 = vsyncpa [#allocation4], 0 }
   0x3   :  { %14 = vsyncpa [#allocation4 + $0x1], 0 }
   0x4   :  { %15 = vsyncpa [#allocation7], 0 }
   0x5   :  { %17 = vsyncpa [#allocation7 + $0x1], 0  ;;  %s898_s12 = smov 0   ;;  %s900_s13 = smov 0  }
   0x6   :  { %s902_s14 = smov 0   ;;  %s904_s15 = smov 0  }
   0x7   :  { %s906_s16 = smov 0   ;;  %s908_s17 = smov 0  }
   0x8 LB: > { %s632_s18 = sadd.s32 4294967295, %s874_s17   ;;  %s633_s19 = sadd.s32 4294967294, %s874_s17   ;;  %s874_s17 = sphi %s908_s17, %s23_s17   ;;  %s870_s16 = sphi %s906_s16, %s1105_s16   ;;  %s866_s15 = sphi %s904_s15, %s1104_s15   ;;  %s862_s14 = sphi %s902_s14, %s1103_s14   ;;  %s858_s13 = sphi %s900_s13, %s1102_s13   ;;  %s854_s12 = sphi %s898_s12, %s1101_s12  }
   0x9   : > { %s42_s20 = sadd.s32 1, %s870_s16  ;;  %s57_s21 = sadd.s32 1, %s862_s14 }
   0xa   : > { %p44_p0 = scmp.ge.s32.totalorder %s42_s20, 2  ;;  %p64_p1 = scmp.ne.s32.totalorder %s862_s14, %s858_s13 }
   0xb   : > { %p65_p2 = scmp.eq.s32.totalorder %s874_s17, 0  ;;  %p70_p3 = scmp.ne.s32.totalorder %s858_s13, %s854_s12 }
   0xc   : > { %s1107_s20 = smov (%p44_p0, %s42_s20), 0  ;;  %p71_p5 = scmp.eq.s32.totalorder %s632_s18, 0 }
   0xd   : > { %p939_p4 = por %p65_p2, %p64_p1  ;;  %s52_s23 = ssub.s32 %s870_s16, %s1107_s20 }
   0xe   : > { %p130_p6 = scmp.eq.s32.totalorder %s632_s18, 1  ;;  %p55_p7 = scmp.eq.s32.totalorder %s52_s23, 0 }
   0xf   : > { %p945_p8 = por %p71_p5, %p70_p3  ;;  %p136_p10 = scmp.eq.s32.totalorder %s633_s19, 1 }
  0x10   : > { %p949_p9 = por %p130_p6, %p64_p1  ;;  %p635_p12 = scmp.ge.s32.totalorder %s874_s17, 2 }
  0x11   : > { %s954_s26 = scalar_select %p55_p7, %s862_s14, %s57_s21  }
  0x12   : > { %p956_p11 = por %p136_p10, %p70_p3  ;;  %p668_p13 = scmp.lt.s32.totalorder %s874_s17, 2 }
  0x13   : > { %s184_s28 = sand.u32 1, %s862_s14   ;;  %s650_s30 = sshll.u32 %s870_s16, 3 }
  0x14   : > { %s636_s29 = sshll.u32 %s184_s28, 3  ;;  %s198_s6 = scalar_lea.hbm %s1089_s0, %s650_s30 }
  0x15   : > { %s188_s7 = scalar_lea.vmem [#allocation2], %s636_s29  ;;  %s200_s9 = sshll.u32 %s198_s6, 4  ;;  %s201_s9 = int_to_ptr.hbm [resolvable:$true] %s200_s9 }
  0x16   : > { %s202_s8 = sshll.u32 %s188_s7, 4  ;;  %p658_p0 = pnand %p668_p13, %p939_p4  ;;  %s203_s8 = int_to_ptr.vmem [resolvable:$true] %s202_s8 }
  0x17   : > { %p639_p1 = scmp.ge.s32.totalorder %s874_s17, 1  ;;  %p225_p2 = scmp.lt.s32.totalorder %s874_s17, 3 }
  0x18   : > { %s185_s10 = scalar_lea.sflag [#allocation3], %s184_s28 }
  0x19   : > { %660 = dma.hbm_to_vmem [thread:$0]  (!%p658_p0), %s201_s9, 128, %s203_s8, %s185_s10  }
  0x1a   : > { %p226_p3 = pnand %p639_p1, %p225_p2 }
  0x1b   : > { %s972_s11 = sand.u32 (!%p226_p3), 1, %s858_s13  }
  0x1c   : > { %229 = sbr.rel (%p226_p3) target bundleno = 136 (0x88), region = 28  ;;  %s640_s18 = sshll.u32 (!%p226_p3), %s972_s11, 3 }
  0x1d   : > { %s232_s19 = scalar_lea.sflag (!%p226_p3), [#allocation3], %s972_s11  ;;  %s235_s21 = scalar_lea.vmem (!%p226_p3), [#allocation2], %s640_s18 }
  0x21   : > { %841 = dma.done.wait (%p945_p8), %s232_s19, 128  }
  0x22   : > { %843 = vsyncadd (%p945_p8), %s232_s19, 4294967168  ;;  %v306_v0 = vld [vmem:[%s235_s21] sm:$0xff]  ;;  %vm315_vm0 = vcmask 1043456   ;;  %s641_s22 = sshll.u32 %s972_s11, 1  ;;  %p283_p4 = scmp.lt.s32.totalorder %s866_s15, 1  ;;  %v300_v19 = vlaneseq  ;;  %v876_v23 = vmov 0.0  }
  0x23   : > { %310 = vst [vmem:[#allocation1] ss:$2 sm:$0xff] %v306_v0  ;;  %s990_s24 = scalar_lea.vmem [#allocation5], %s641_s22  ;;  %s995_s29 = scalar_lea.vmem [#allocation6], %s641_s22  ;;  %v877_v54 = vmov 1   ;;  %vm420_vm4 = vcmask 1041408  }
  0x24   : > { %s284_s23 = scalar_select %p283_p4, %s866_s15, 1  ;;  %vm986_vm1 = vcmp.lt.s32.totalorder %v300_v19, 256  ;;  %v359_v33 = vshrl.u32 %v300_v19, 7  ;;  %v419_v55 = vrot.slane %v877_v54, 6  ;;  %vm437_vm8 = vcmask 1040384  }
  0x25   : > { %304 = vst.msk [vmem:[%s990_s24] sm:$0x3] %vm986_vm1, %v876_v23  ;;  %s646_s6 = sshll.u32 %s866_s15, 1  ;;  %vm439_vm9 = vcmask 1042434   ;;  %s495_s10 = sshll.u32 %s995_s29, 4  ;;  %s496_s10 = int_to_ptr.vmem [resolvable:$true] %s495_s10 }
  0x26   : > { %s643_s28 = sshll.u32 %s284_s23, 1  ;;  %305 = vst.msk [vmem:[%s995_s29] sm:$0x3] %vm986_vm1, %v876_v23  ;;  %v421_v60 = vsel %vm420_vm4, 1, %v419_v55  ;;  %s493_s9 = scalar_lea.hbm %s1092_s3, %s646_s6 }
  0x27   : > { %s289_s5 = scalar_lea.vmem %s1090_s1, %s643_s28  ;;  %vm422_vm6 = vcmp.ne.s32.totalorder %v421_v60, 0  ;;  %s497_s18 = sshll.u32 %s493_s9, 4  ;;  %s498_s18 = int_to_ptr.hbm [resolvable:$true] %s497_s18 }
  0x28   : > { %v307_v24 = vld [vmem:[%s289_s5] sm:$0x3]  ;;  %s467_s19 = scalar_lea.sflag [#allocation7], %s972_s11  ;;  %s774_s21 = sshra.s32 %s498_s18, 4  ;;  %s775_s21 = int_to_ptr.hbm [resolvable:$true] %s774_s21 }
  0x29   : > { %v308_v26 = vunpack.c.l.b16 %v307_v24  ;;  %s776_s22 = scalar_lea.hbm %s775_s21, 2  ;;  %s780_s30 = scalar_lea.hbm %s1092_s3, 4 }
  0x2a   : > { %v311_v1 = vld.sshfl [vmem:[#allocation1] sm:$0xff pattern:$0x75316420]  ;;  %v312_v2 = vld.sshfl [vmem:[#allocation1 + $0x8] sm:$0xff pattern:$0x75316420]  ;;  %p777_p5 = scmp.ne.s32.totalorder %s775_s21, %s776_s22  ;;  %p781_p8 = scmp.lt.s32.totalorder %s775_s21, %s1092_s3 }
  0x2b   : > { %v316_v3 = vsel %vm315_vm0, %v311_v1, -inf  ;;  %v323_v4 = vsel %vm315_vm0, %v312_v2, -inf  ;;  %v360_v27 = vperm.slane %v308_v26, 0  ;;  %v361_v28 = vperm.slane %v308_v26, 2  ;;  %p782_p10 = scmp.lt.s32.totalorder %s780_s30, %s776_s22 }
  0x2c   : > { %v317_v5 = vrot.slane %v316_v3, 4  ;;  %v324_v6 = vrot.slane %v323_v4, 4  ;;  %vm416_vm5 = vcmp.ne.s32.totalorder %v308_v26, 255  ;;  %p778_p6 = pnand %p777_p5, %p949_p9 }
  0x2d   : > { %v362_v36 = vperm.slane %v360_v27, 0  ;;  %v363_v37 = vperm.slane %v361_v28, 0  ;;  %vm1009_vm7 = vmand %vm416_vm5, %vm422_vm6  ;;  %p783_p13 = por %p782_p10, %p781_p8 }
  0x2e   : > { %v318_v7 = vmax.f32 %v316_v3, %v317_v5  ;;  %v325_v8 = vmax.f32 %v323_v4, %v324_v6  ;;  %p779_p7 = pneg %p778_p6 }
  0x2f   : > { %vm364_vm2 = vcmp.eq.s32.totalorder %v359_v33, %v362_v36  ;;  %vm365_vm3 = vcmp.eq.s32.totalorder %v359_v33, %v363_v37 }
  0x30   : > { %v319_v9 = vrot.slane %v318_v7, 2  ;;  %v326_v10 = vrot.slane %v325_v8, 2  ;;  %p784_p0 = pnand %p783_p13, %p779_p7 }
  0x32   : > { %v320_v11 = vmax.f32 %v318_v7, %v319_v9  ;;  %v327_v12 = vmax.f32 %v325_v8, %v326_v10  ;;  %v449_v10 = vld [vmem:[%s995_s29] sm:$0x3] }
  0x34   : > { %v321_v13 = vrot.slane %v320_v11, 1  ;;  %v328_v14 = vrot.slane %v327_v12, 1 }
  0x36   : > { %v329_v15 = vmax.f32 %v327_v12, %v328_v14  ;;  %v322_v16 = vmax.f32 %v320_v11, %v321_v13 }
  0x38   : > { %v332_v17 = vrot.slane %v329_v15, 4 }
  0x3a   : > { %v333_v18 = vsel %vm315_vm0, %v322_v16, %v332_v17 }
  0x3b   : > { %v335_v20 = vsub.f32 %v306_v0, %v333_v18  ;;  %v450_v0 = vsel %vm1009_vm7, 1.0, %v876_v23 }
  0x3c   : > { %v452_v3 = vrot.slane %v450_v0, 1  ;;  %v453_v4 = vrot.slane %v450_v0, 2  ;;  %v454_v5 = vrot.slane %v450_v0, 3 }
  0x3d   : > { %v336_v22 = vmul.f32 1.442695, %v335_v20 }
  0x3e   : > { %v455_v8 = vsel %vm437_vm8, %v450_v0, %v452_v3  ;;  %v456_v11 = vsel %vm439_vm9, %v453_v4, %v454_v5 }
  0x3f   : > { %720 = vpow2.f32 %v336_v22  ;;  %v457_v16 = vsel %vm420_vm4, %v455_v8, %v456_v11 }
  0x40   : > { %v459_v18 = vadd.f32 %v457_v16, %v449_v10 }
  0x42   : > { %460 = vst.msk [vmem:[%s995_s29] sm:$0x3] %vm986_vm1, %v459_v18 }
  0x45   : > { %v721_v25 = vpop.eup %720 }
  0x46   : > { %339 = vst [vmem:[#allocation1] ss:$2 sm:$0xff] %v721_v25 }
  0x4d   : > { %v340_v29 = vld.sshfl [vmem:[#allocation1] sm:$0xff pattern:$0x75316420]  ;;  %v341_v30 = vld.sshfl [vmem:[#allocation1 + $0x8] sm:$0xff pattern:$0x75316420] }
  0x4e   : > { %v344_v31 = vsel %vm315_vm0, %v340_v29, 0.0  ;;  %v351_v32 = vsel %vm315_vm0, %v341_v30, 0.0  ;;  %367 = vst [vmem:[#allocation1] ss:$2 sm:$0xff] %v335_v20 }
  0x4f   : > { %v345_v34 = vrot.slane %v344_v31, 4  ;;  %v352_v35 = vrot.slane %v351_v32, 4 }
  0x51   : > { %v346_v38 = vadd.f32 %v345_v34, %v344_v31  ;;  %v353_v39 = vadd.f32 %v352_v35, %v351_v32 }
  0x53   : > { %v347_v40 = vrot.slane %v346_v38, 2  ;;  %v354_v41 = vrot.slane %v353_v39, 2 }
  0x55   : > { %v348_v42 = vadd.f32 %v347_v40, %v346_v38  ;;  %v355_v43 = vadd.f32 %v354_v41, %v353_v39  ;;  %v368_v44 = vld.sshfl [vmem:[#allocation1] sm:$0xff pattern:$0x75316420]  ;;  %v369_v45 = vld.sshfl [vmem:[#allocation1 + $0x8] sm:$0xff pattern:$0x75316420] }
  0x56   : > { %v372_v46 = vsel %vm364_vm2, %v368_v44, 0.0  ;;  %v373_v47 = vsel %vm365_vm3, %v369_v45, 0.0 }
  0x57   : > { %v349_v48 = vrot.slane %v348_v42, 1  ;;  %v356_v49 = vrot.slane %v355_v43, 1  ;;  %v374_v50 = vsel %vm315_vm0, %v372_v46, 0.0  ;;  %v381_v51 = vsel %vm315_vm0, %v373_v47, 0.0 }
  0x58   : > { %v375_v52 = vrot.slane %v374_v50, 4  ;;  %v382_v53 = vrot.slane %v381_v51, 4 }
  0x59   : > { %v350_v56 = vadd.f32 %v349_v48, %v348_v42  ;;  %v357_v57 = vadd.f32 %v356_v49, %v355_v43 }
  0x5a   : > { %v376_v58 = vadd.f32 %v375_v52, %v374_v50  ;;  %v383_v59 = vadd.f32 %v382_v53, %v381_v51 }
  0x5b   : > { %722 = vlog2.f32 %v350_v56 }
  0x5c   : > { %724 = vlog2.f32 %v357_v57  ;;  %v377_v61 = vrot.slane %v376_v58, 2  ;;  %v384_v62 = vrot.slane %v383_v59, 2 }
  0x5e   : > { %v378_v1 = vadd.f32 %v377_v61, %v376_v58  ;;  %v385_v2 = vadd.f32 %v384_v62, %v383_v59 }
  0x60   : > { %v379_v6 = vrot.slane %v378_v1, 1  ;;  %v386_v7 = vrot.slane %v385_v2, 1 }
  0x61   : > { %v723_v9 = vpop.eup %722 }
  0x62   : > { %v725_v12 = vpop.eup %724  ;;  %v380_v13 = vadd.f32 %v379_v6, %v378_v1  ;;  %v387_v14 = vadd.f32 %v386_v7, %v385_v2  ;;  %v389_v15 = vmul.f32 0.6931472, %v723_v9 }
  0x63   : > { %v391_v17 = vmul.f32 0.6931472, %v725_v12 }
  0x64   : > { %v392_v19 = vsub.f32 %v380_v13, %v389_v15 }
  0x65   : > { %v393_v20 = vsub.f32 %v387_v14, %v391_v17 }
  0x66   : > { %v394_v22 = vmul.f32 1.442695, %v392_v19 }
  0x67   : > { %787 = shalt.err (!%p784_p0)
}
  0x68   : > { %654 = dma.vmem_to_hbm [thread:$0]  (%p949_p9), %s496_s10, 32, %s498_s18, %s467_s19   ;;  %v396_v23 = vmul.f32 1.442695, %v393_v20  ;;  %726 = vpow2.f32 %v394_v22  ;;  %v424_v42 = vld [vmem:[%s990_s24] sm:$0x3] }
  0x69   : > { %s478_s8 = scalar_lea.hbm %s1091_s2, %s646_s6  ;;  %s480_s9 = sshll.u32 %s990_s24, 4  ;;  %s481_s9 = int_to_ptr.vmem [resolvable:$true] %s480_s9 }
  0x6a   : > { %728 = vpow2.f32 %v396_v23  ;;  %s482_s10 = sshll.u32 %s478_s8, 4  ;;  %s462_s15 = scalar_lea.sflag [#allocation4], %s972_s11  ;;  %s483_s10 = int_to_ptr.hbm [resolvable:$true] %s482_s10 }
  0x6b   : > { %s802_s6 = sshra.s32 %s483_s10, 4  ;;  %s808_s22 = scalar_lea.hbm %s1091_s2, 4  ;;  %s803_s6 = int_to_ptr.hbm [resolvable:$true] %s802_s6 }
  0x6c   : > { %s804_s18 = scalar_lea.hbm %s803_s6, 2  ;;  %p809_p4 = scmp.lt.s32.totalorder %s803_s6, %s1091_s2 }
  0x6d   : > { %p805_p1 = scmp.ne.s32.totalorder %s803_s6, %s804_s18  ;;  %p810_p5 = scmp.lt.s32.totalorder %s808_s22, %s804_s18 }
  0x6e   : > { %v727_v24 = vpop.eup %726 }
  0x6f   : > { %v398_v26 = vsub.f32 1.0, %v727_v24  ;;  %p806_p2 = pnand %p805_p1, %p949_p9  ;;  %p811_p6 = por %p810_p5, %p809_p4 }
  0x70   : > { %v729_v25 = vpop.eup %728 }
  0x71   : > { %v399_v27 = vsub.f32 1.0, %v729_v25  ;;  %v400_v28 = vmax.f32 %v398_v26, 0.0  ;;  %p807_p3 = pneg %p806_p2 }
  0x73   : > { %v401_v29 = vmax.f32 %v399_v27, 0.0  ;;  %v402_v30 = vmul.f32 %v400_v28, %v400_v28  ;;  %p812_p7 = pnand %p811_p6, %p807_p3 }
  0x75   : > { %v403_v31 = vmul.f32 %v401_v29, %v401_v29  ;;  %v404_v32 = vmul.f32 %v402_v30, %v392_v19 }
  0x77   : > { %v405_v33 = vmul.f32 %v403_v31, %v393_v20  ;;  %v425_v35 = vsub.f32 0.0, %v404_v32 }
  0x79   : > { %v426_v34 = vsub.f32 0.0, %v405_v33 }
  0x7b   : > { %v429_v36 = vrot.slane %v426_v34, 6 }
  0x7d   : > { %v430_v37 = vsel %vm420_vm4, %v425_v35, %v429_v36 }
  0x7e   : > { %v432_v38 = vsel %vm1009_vm7, %v430_v37, 0.0 }
  0x7f   : > { %v434_v39 = vrot.slane %v432_v38, 1  ;;  %v435_v40 = vrot.slane %v432_v38, 2  ;;  %v436_v41 = vrot.slane %v432_v38, 3 }
  0x81   : > { %v438_v43 = vsel %vm437_vm8, %v432_v38, %v434_v39  ;;  %v440_v44 = vsel %vm439_vm9, %v435_v40, %v436_v41 }
  0x82   : > { %v441_v45 = vsel %vm420_vm4, %v438_v43, %v440_v44 }
  0x83   : > { %v443_v46 = vadd.f32 %v441_v45, %v424_v42 }
  0x85   : > { %448 = vst.msk [vmem:[%s990_s24] sm:$0x3] %vm986_vm1, %v443_v46 }
  0x86   : > { %815 = shalt.err (!%p812_p7)
}
  0x87   : > { %653 = dma.vmem_to_hbm [thread:$0]  (%p949_p9), %s481_s9, 32, %s483_s10, %s462_s15  }
  0x88 PF: > { %s509_s11 = sand.u32 1, %s854_s12   ;;  %p662_p8 = pnand %p635_p12, %p956_p11 }
  0x89   : > { %s510_s24 = scalar_lea.sflag [#allocation4], %s509_s11 }
  0x8a   : > { %p663_p10 = pneg %p662_p8 }
  0x8c   : > { %845 = dma.done.wait (%p663_p10), %s510_s24, 32  }
  0x8d   : > { %847 = vsyncadd (%p663_p10), %s510_s24, 4294967264  ;;  %s520_s30 = scalar_lea.sflag [#allocation7], %s509_s11 }
  0x8e   : > { %849 = dma.done.wait (%p663_p10), %s520_s30, 32  }
  0x8f   : > { %851 = vsyncadd (%p663_p10), %s520_s30, 4294967264  ;;  %s23_s17 = sadd.s32 1, %s874_s17   ;;  %s1101_s12 = smov %s858_s13 }
  0x90   : > { %p20_p13 = scmp.ge.s32.totalorder %s23_s17, 4   ;;  %s1102_s13 = smov %s862_s14 }
  0x91   : > { %s1103_s14 = smov %s954_s26  ;;  %s1104_s15 = smov %s870_s16 }
  0x92   : > { %s1105_s16 = smov %s1107_s20  ;;  %22 = sbr.rel (!%p20_p13) target bundleno = 8 (0x8), region = 97 }
  0x97   :  { %526 = vsyncpa [#allocation3], 1 }
  0x98   :  { %528 = vsyncpa [#allocation3 + $0x1], 1 }
  0x99   :  { %529 = vsyncpa [#allocation4], 1 }
  0x9a   :  { %531 = vsyncpa [#allocation4 + $0x1], 1 }
  0x9b   :  { %532 = vsyncpa [#allocation7], 1 }
  0x9c   :  { %534 = vsyncpa [#allocation7 + $0x1], 1 }

</bundles_post_ra>
